<compile_context>
chip_gen: v7x
topology: tpu7x:2x2x1
jax: 0.10.0
libtpu: 0.0.40
codegen_flags: <defaults>
</compile_context>

<pallas_src>
import numpy as np
import jax
import jax.numpy as jnp
from jax.experimental import pallas as pl
from jax.experimental.pallas import tpu as pltpu

# ---------------------------------------------------------------------------
# Model hyper-parameters (synthetic "model" wrapped by SHAPHelper)
# ---------------------------------------------------------------------------
C_IN = 4
C_OUT = 8
KH = KW = 3
NUM_CLASSES = 10
H = W = 16
HP, WP = H + KH - 1, W + KW - 1      # zero-padded spatial dims (18, 18)
KDIM = WP * C_IN                     # 72  : contraction width per conv-kernel row
KFUSED = KH * KDIM                   # 216 : fused contraction width (all 3 kernel rows)
LANES = W * C_OUT                    # 128 : conv output lane width (out-col * C_OUT + ch)
OUT_LANES = 128                      # lane-dense (padded) classifier output width


# ---------------------------------------------------------------------------
# Pallas kernel: forward pass for a tile of bt images
#   x_ref     : (bt*16, 216)   bf16 row-window layout: row = b*16+y,
#                              lane = i*72 + padded_col*4 + in_channel
#   wconv_ref : (216, 128)     bf16 fused conv weight (kernel rows stacked along K,
#                              column shift j and Cin contraction folded in)
#   bconv_ref : (1, 128)       f32 conv bias tiled over the 16 output columns
#   whead_ref : (128, 128)     bf16 (col-sum pooling x w_fc) / (H*W), zero-padded to 128
#   bfc_ref   : (1, 128)       f32 head bias zero-padded to 128
#   out_ref   : (bt, 128)      f32 logits (first NUM_CLASSES lanes valid)
# ---------------------------------------------------------------------------
def _model_kernel(x_ref, wconv_ref, bconv_ref, whead_ref, bfc_ref, out_ref):
    bt = out_ref.shape[0]

    # Fused convolution: a single (bt*16, 216) x (216, 128) MXU matmul, f32 accumulate.
    acc = jnp.dot(x_ref[...], wconv_ref[...], preferred_element_type=jnp.float32)

    # Bias + ReLU (full 128-lane VPU ops in f32).
    conv = jnp.maximum(acc + bconv_ref[...], 0.0)                     # (bt*16, 128)

    # Global average pool: sum over the 16 output rows here; the sum over output
    # columns and the 1/(H*W) factor are folded into the head weight.
    col_sums = jnp.sum(conv.reshape(bt, H, LANES), axis=1)            # (bt, 128)

    logits = jnp.dot(col_sums.astype(whead_ref.dtype), whead_ref[...],
                     preferred_element_type=jnp.float32) + bfc_ref[...]
    out_ref[...] = logits.astype(out_ref.dtype)                       # lane-dense store


# ---------------------------------------------------------------------------
# Wrapper: layout prep + pallas_call
# ---------------------------------------------------------------------------
def _pallas_model_forward(x_nchw, wconv, bconv, whead, bfc):
    B = x_nchw.shape[0]

    # Lane-dense, zero-padded, pre-gathered row-window layout (B*16, 216) in bf16.
    x = jnp.transpose(x_nchw.astype(jnp.bfloat16), (0, 2, 3, 1))          # NHWC
    x = jnp.pad(x, ((0, 0), (1, 1), (1, 1), (0, 0)))                      # (B,18,18,4)
    x = x.reshape(B, HP, KDIM)                                            # (B,18,72)
    x = jnp.concatenate([x[:, i:i + H, :] for i in range(KH)], axis=-1)   # (B,16,216)
    x = x.reshape(B * H, KFUSED)

    # Batch tiling: big tiles amortize the ~0.35us/step pipeline overhead. Tiny batches
    # are not split at all; otherwise num_tiles is derived from BT_TARGET, kept even
    # (v7x: 2 TensorCores share the "parallel" axis) and bt is a multiple of 8 so block
    # shapes stay (8,128)-aligned. bt <= 512 keeps VMEM well inside v7x's 64 MiB.
    BT_TARGET = 512
    MIN_TILE = 64
    if B < 2 * MIN_TILE:
        num_tiles, bt = 1, B
    else:
        num_tiles = -(-B // BT_TARGET)
        num_tiles += num_tiles % 2                  # even split across v7x's two TCs
        bt = -(-B // num_tiles)
        bt = ((bt + 7) // 8) * 8                    # (8,128) alignment of block shapes
    bp = num_tiles * bt
    if bp != B:
        x = jnp.pad(x, ((0, (bp - B) * H), (0, 0)))

    out = pl.pallas_call(
        _model_kernel,
        out_shape=jax.ShapeDtypeStruct((bp, OUT_LANES), jnp.float32),
        grid_spec=pl.GridSpec(
            grid=(num_tiles,),
            in_specs=[
                pl.BlockSpec((bt * H, KFUSED), lambda b: (b, 0)),      # images
                pl.BlockSpec((KFUSED, LANES), lambda b: (0, 0)),       # fused conv weight
                pl.BlockSpec((1, LANES), lambda b: (0, 0)),            # conv bias (tiled)
                pl.BlockSpec((LANES, OUT_LANES), lambda b: (0, 0)),    # pooled head weight
                pl.BlockSpec((1, OUT_LANES), lambda b: (0, 0)),        # head bias (padded)
            ],
            out_specs=pl.BlockSpec((bt, OUT_LANES), lambda b: (b, 0)),
        ),
        compiler_params=pltpu.CompilerParams(
            dimension_semantics=("parallel",),
            vmem_limit_bytes=48 * 1024 * 1024,
            allow_input_fusion=[True, False, False, False, False]),
    )(x, wconv, bconv, whead, bfc)
    return out[:B, :NUM_CLASSES]


# ---------------------------------------------------------------------------
# Parameter construction (PyTorch layouts) and kernel-operand preparation
# ---------------------------------------------------------------------------
def _init_params(key):
    k1, k2, k3, k4 = jax.random.split(key, 4)
    w_conv = jax.random.normal(k1, (C_OUT, C_IN, KH, KW), jnp.float32) * 0.1   # torch OIHW
    b_conv = jax.random.normal(k2, (C_OUT,), jnp.float32) * 0.1
    w_fc_t = jax.random.normal(k3, (NUM_CLASSES, C_OUT), jnp.float32) * 0.1    # torch (out, in)
    b_fc = jax.random.normal(k4, (NUM_CLASSES,), jnp.float32) * 0.1
    return w_conv, b_conv, w_fc_t, b_fc


def _prep_kernel_params(w_conv, b_conv, w_fc_t, b_fc):
    """Rearrange PyTorch-layout weights into the matmul-friendly kernel operands."""
    eye_w = jnp.eye(W, dtype=jnp.float32)
    per_row = []
    for i in range(KH):
        wi = jnp.zeros((KDIM, LANES), jnp.float32)
        for j in range(KW):
            w_tap = jnp.transpose(w_conv[:, :, i, j])            # (C_IN, C_OUT)
            blk = jnp.kron(eye_w, w_tap)                         # block-diag (W*C_IN, W*C_OUT)
            # shift block rows by j*C_IN so the column offset j is baked into the weight
            wi = wi + jnp.pad(blk, ((j * C_IN, (KW - 1 - j) * C_IN), (0, 0)))
        per_row.append(wi)
    # Stack the three kernel-row weights along K -> one fused (216, 128) bf16 weight.
    wconv_fused = jnp.concatenate(per_row, axis=0).astype(jnp.bfloat16)   # (216, 128)

    bconv_tiled = jnp.tile(b_conv, W).reshape(1, LANES)                    # (1, 128) f32

    w_fc = jnp.transpose(w_fc_t)                                           # (C_OUT, 10)
    # column-sum pooling + 1/(H*W) folded into the classifier weight; pad to 128 lanes.
    w_head = jnp.kron(jnp.ones((W, 1), jnp.float32), w_fc) / float(H * W)  # (128, 10)
    w_head = jnp.pad(w_head, ((0, 0), (0, OUT_LANES - NUM_CLASSES))).astype(jnp.bfloat16)
    b_fc_p = jnp.pad(b_fc, (0, OUT_LANES - NUM_CLASSES)).reshape(1, OUT_LANES)  # (1,128) f32
    return wconv_fused, bconv_tiled, w_head, b_fc_p


# ---------------------------------------------------------------------------
# SHAPHelper equivalent: numpy in -> model forward (Pallas) -> numpy out
# ---------------------------------------------------------------------------
class SHAPHelperPallas:
    def __init__(self, torch_layout_params):
        self._kernel_params = _prep_kernel_params(*torch_layout_params)
        self._fwd = jax.jit(_pallas_model_forward)

    def __call__(self, data):
        # Mirror torch.tensor(data, dtype=torch.float32).cuda(); model(data); .cpu().numpy()
        x = jnp.asarray(np.asarray(data), dtype=jnp.float32)
        out = self._fwd(x, *self._kernel_params)
        return np.asarray(jax.block_until_ready(out))


def _reference_forward(x_nchw, w_conv, b_conv, w_fc_t, b_fc):
    """Plain-JAX reference of the same model (independent code path, full f32)."""
    x = x_nchw.astype(jnp.float32)
    conv = jax.lax.conv_general_dilated(
        x, w_conv, window_strides=(1, 1), padding="SAME",
        dimension_numbers=("NCHW", "OIHW", "NCHW"),
        precision=jax.lax.Precision.HIGHEST)
    conv = jnp.maximum(conv + b_conv.reshape(1, C_OUT, 1, 1), 0.0)
    pooled = jnp.mean(conv, axis=(2, 3))                                  # (B, C_OUT)
    return jnp.dot(pooled, jnp.transpose(w_fc_t),
                   precision=jax.lax.Precision.HIGHEST) + b_fc


if __name__ == "__main__":
    key = jax.random.PRNGKey(0)
    pkey, xkey = jax.random.split(key)

    params = _init_params(pkey)
    helper = SHAPHelperPallas(params)

    # Small deterministic input, PyTorch NCHW convention: [B, C, H, W]
    x = jax.random.normal(xkey, (2, C_IN, H, W), jnp.float32)
    x_np = np.asarray(x)                                     # SHAPHelper receives numpy data

    out = helper(x_np)                                       # (2, NUM_CLASSES) numpy
    jax.block_until_ready(out)

    ref = np.asarray(_reference_forward(jnp.asarray(x_np), *params))
    assert out.shape == (2, NUM_CLASSES)
    # bf16 MXU operands (f32 accumulation) vs HIGHEST-precision f32 reference.
    assert np.allclose(out, ref, atol=2e-2, rtol=2e-2)

    print("KERNEL_OK")
</pallas_src>

<mosaic_0001>
module attributes {stable_mosaic.version = 11 : i64} {
  func.func @_model_kernel(%arg0: i32, %arg1: memref<32x216xbf16, #tpu.memory_space<vmem>>, %arg2: memref<216x128xbf16, #tpu.memory_space<vmem>>, %arg3: memref<1x128xf32, #tpu.memory_space<vmem>>, %arg4: memref<128x128xbf16, #tpu.memory_space<vmem>>, %arg5: memref<1x128xf32, #tpu.memory_space<vmem>>, %arg6: memref<2x128xf32, #tpu.memory_space<vmem>>) attributes {dimension_semantics = [#tpu.dimension_semantics<parallel>], iteration_bounds = array<i64: 1>, scalar_prefetch = 0 : i64, scratch_operands = 0 : i64, tpu.core_type = #tpu.core_type<tc>, window_params = [{transform_indices = @transform_0, window_bounds = array<i64: 32, 216>}, {pipeline_mode = #tpu.pipeline_mode<synchronous>, transform_indices = @transform_1, window_bounds = array<i64: 216, 128>}, {pipeline_mode = #tpu.pipeline_mode<synchronous>, transform_indices = @transform_2, window_bounds = array<i64: 1, 128>}, {pipeline_mode = #tpu.pipeline_mode<synchronous>, transform_indices = @transform_3, window_bounds = array<i64: 128, 128>}, {pipeline_mode = #tpu.pipeline_mode<synchronous>, transform_indices = @transform_4, window_bounds = array<i64: 1, 128>}, {transform_indices = @transform_5, window_bounds = array<i64: 2, 128>}]} {
    %c0 = arith.constant 0 : index
    %c0_0 = arith.constant 0 : index
    %0 = vector.load %arg1[%c0, %c0_0] : memref<32x216xbf16, #tpu.memory_space<vmem>>, vector<32x216xbf16>
    %c0_1 = arith.constant 0 : index
    %c0_2 = arith.constant 0 : index
    %1 = vector.load %arg2[%c0_1, %c0_2] : memref<216x128xbf16, #tpu.memory_space<vmem>>, vector<216x128xbf16>
    %cst = arith.constant dense<0.000000e+00> : vector<32x128xf32>
    %2 = tpu.matmul %0, %1, %cst {dimension_numbers = #tpu.dot_dimension_numbers<[1], [0], [0], [1], [0, 0, 1, 1], [], []>} : vector<32x216xbf16>, vector<216x128xbf16>, vector<32x128xf32> -> vector<32x128xf32>
    %c0_3 = arith.constant 0 : index
    %c0_4 = arith.constant 0 : index
    %3 = vector.load %arg3[%c0_3, %c0_4] : memref<1x128xf32, #tpu.memory_space<vmem>>, vector<1x128xf32>
    %4 = vector.broadcast %3 : vector<1x128xf32> to vector<32x128xf32>
    %5 = arith.addf %2, %4 : vector<32x128xf32>
    %cst_5 = arith.constant 0.000000e+00 : f32
    %6 = vector.broadcast %cst_5 : f32 to vector<32x128xf32>
    %7 = arith.maximumf %5, %6 : vector<32x128xf32>
    %8 = vector.shape_cast %7 : vector<32x128xf32> to vector<2x16x128xf32>
    %cst_6 = arith.constant dense<0.000000e+00> : vector<2x128xf32>
    %9 = vector.multi_reduction <add>, %8, %cst_6 [1] : vector<2x16x128xf32> to vector<2x128xf32>
    %10 = arith.truncf %9 : vector<2x128xf32> to vector<2x128xbf16>
    %c0_7 = arith.constant 0 : index
    %c0_8 = arith.constant 0 : index
    %11 = vector.load %arg4[%c0_7, %c0_8] : memref<128x128xbf16, #tpu.memory_space<vmem>>, vector<128x128xbf16>
    %cst_9 = arith.constant dense<0.000000e+00> : vector<2x128xf32>
    %12 = tpu.matmul %10, %11, %cst_9 {dimension_numbers = #tpu.dot_dimension_numbers<[1], [0], [0], [1], [0, 0, 1, 1], [], []>} : vector<2x128xbf16>, vector<128x128xbf16>, vector<2x128xf32> -> vector<2x128xf32>
    %c0_10 = arith.constant 0 : index
    %c0_11 = arith.constant 0 : index
    %13 = vector.load %arg5[%c0_10, %c0_11] : memref<1x128xf32, #tpu.memory_space<vmem>>, vector<1x128xf32>
    %14 = vector.broadcast %13 : vector<1x128xf32> to vector<2x128xf32>
    %15 = arith.addf %12, %14 : vector<2x128xf32>
    %c0_12 = arith.constant 0 : index
    %c0_13 = arith.constant 0 : index
    %16 = vector.load %arg6[%c0_12, %c0_13] : memref<2x128xf32, #tpu.memory_space<vmem>>, vector<2x128xf32>
    tpu.vector_store %arg6[%c0_12, %c0_13], %15 {strides = array<i32>} : memref<2x128xf32, #tpu.memory_space<vmem>>, vector<2x128xf32>,
    return
  }
  func.func @transform_0(%arg0: i32) -> (i32, i32) {
    %c0_i32 = arith.constant 0 : i32
    %c0_i32_0 = arith.constant 0 : i32
    return %arg0, %c0_i32 : i32, i32
  }
  func.func @transform_1(%arg0: i32) -> (i32, i32) {
    %c0_i32 = arith.constant 0 : i32
    %c0_i32_0 = arith.constant 0 : i32
    %c0_i32_1 = arith.constant 0 : i32
    return %c0_i32, %c0_i32_0 : i32, i32
  }
  func.func @transform_2(%arg0: i32) -> (i32, i32) {
    %c0_i32 = arith.constant 0 : i32
    %c0_i32_0 = arith.constant 0 : i32
    %c0_i32_1 = arith.constant 0 : i32
    return %c0_i32, %c0_i32_0 : i32, i32
  }
  func.func @transform_3(%arg0: i32) -> (i32, i32) {
    %c0_i32 = arith.constant 0 : i32
    %c0_i32_0 = arith.constant 0 : i32
    %c0_i32_1 = arith.constant 0 : i32
    return %c0_i32, %c0_i32_0 : i32, i32
  }
  func.func @transform_4(%arg0: i32) -> (i32, i32) {
    %c0_i32 = arith.constant 0 : i32
    %c0_i32_0 = arith.constant 0 : i32
    %c0_i32_1 = arith.constant 0 : i32
    return %c0_i32, %c0_i32_0 : i32, i32
  }
  func.func @transform_5(%arg0: i32) -> (i32, i32) {
    %c0_i32 = arith.constant 0 : i32
    %c0_i32_0 = arith.constant 0 : i32
    return %arg0, %c0_i32 : i32, i32
  }
}

</mosaic_0001>

<bundles_post_ra>
// kernel: _pallas_model_forward.1
= control target key start
LH: loop header
LB: loop body
LE: loop exit
PB: predicated region body
PF: predicated region fallthrough
CT: control target
= control target key end

     0   :  { %v488_v1 = vmov 0   ;;  %vm159_vm0 = vcmask 719872   ;;  %s620_s0 = inlined_call_operand.vmem [shape: bf16[32,216], index: 0, kind: input, shape index: {}]   ;;  %s621_s1 = inlined_call_operand.vmem [shape: bf16[216,128], index: 1, kind: input, shape index: {}]   ;;  %s622_s2 = inlined_call_operand.vmem [shape: f32[1,128], index: 2, kind: input, shape index: {}]   ;;  %s623_s3 = inlined_call_operand.vmem [shape: bf16[128,128], index: 3, kind: input, shape index: {}]   ;;  %s624_s4 = inlined_call_operand.vmem [shape: f32[1,128], index: 4, kind: input, shape index: {}]   ;;  %s625_s5 = inlined_call_operand.hbm [shape: f32[2,128], index: 5, kind: output, shape index: {}]  }
   0x1   :  { %v436_v0 = vld [vmem:[%s621_s1] sm:$0xff]   ;;  %170 = vmatprep.subr.bf16.mxu0 %v488_v1  ;;  %v437_v2 = vld [vmem:[%s621_s1 + $0x8] sm:$0xff]   ;;  %v438_v3 = vld [vmem:[%s621_s1 + $0x10] sm:$0xff]  }
   0x2   :  { %171 = vmatpush1.bf16.msra.mxu0 %v436_v0  ;;  %v439_v4 = vld [vmem:[%s621_s1 + $0x18] sm:$0xff]   ;;  %v440_v5 = vld [vmem:[%s621_s1 + $0x20] sm:$0xff]   ;;  %v441_v7 = vld [vmem:[%s621_s1 + $0x28] sm:$0xff]  }
   0x3   :  { %172 = vmatprep.subr.bf16.mxu0 %v488_v1  ;;  %v452_v6 = vld [vmem:[%s620_s0 + $0x4] ss:$8 sps:$4 sm:$0xff]   ;;  %v442_v8 = vld [vmem:[%s621_s1 + $0x30] sm:$0xff]  }
   0x4   :  { %392 = vmatprep.mubr.msk.bf16.mxu0 %vm159_vm0, %v452_v6 }
   0x6   :  { %173 = vmatpush1.bf16.msra.mxu0 %v437_v2 }
   0x7   :  { %174 = vmatprep.subr.bf16.mxu0 %v488_v1 }
   0xa   :  { %175 = vmatpush1.bf16.msra.mxu0 %v438_v3 }
   0xb   :  { %176 = vmatprep.subr.bf16.mxu0 %v488_v1 }
   0xe   :  { %177 = vmatpush1.bf16.msra.mxu0 %v439_v4 }
   0xf   :  { %178 = vmatprep.subr.bf16.mxu0 %v488_v1 }
  0x12   :  { %179 = vmatpush1.bf16.msra.mxu0 %v440_v5 }
  0x13   :  { %180 = vmatprep.subr.bf16.mxu0 %v488_v1 }
  0x16   :  { %181 = vmatpush1.bf16.msra.mxu0 %v441_v7 }
  0x17   :  { %10 = vsyncpa [#allocation3], 0  ;;  %182 = vmatprep.subr.bf16.mxu0 %v488_v1  ;;  %v443_v9 = vld [vmem:[%s621_s1 + $0x38] sm:$0xff]   ;;  %v444_v10 = vld [vmem:[%s621_s1 + $0x40] sm:$0xff]   ;;  %vm166_vm1 = vcmask 1043456   ;;  %v489_v21 = vmov 0.0  }
  0x18   :  { %v445_v11 = vld [vmem:[%s621_s1 + $0x48] sm:$0xff]   ;;  %v446_v12 = vld [vmem:[%s621_s1 + $0x50] sm:$0xff]   ;;  %v447_v13 = vld [vmem:[%s621_s1 + $0x58] sm:$0xff]   ;;  %412 = vmatprep.subr.bf16.mxu1 %v489_v21  ;;  %vm490_vm2 = vmmov 0   ;;  %vm266_vm3 = vcmask 1041409   ;;  %s491_s20 = smov [#allocation2]  }
  0x19   :  { %v448_v14 = vld [vmem:[%s621_s1 + $0x60] sm:$0xff]   ;;  %v449_v15 = vld [vmem:[%s621_s1 + $0x68] ss:$0 sps:$4 sm:$0xff]   ;;  %v453_v18 = vld [vmem:[%s620_s0 + $0x14] ss:$8 sps:$4 sm:$0xff]   ;;  %428 = vmatprep.mubr.msk.bf16.mxu1 %vm490_vm2, %v489_v21  ;;  %s365_s21 = sshll.u32 %s491_s20, 4  ;;  %s366_s21 = int_to_ptr.vmem [resolvable:$true] %s365_s21 }
  0x1a   :  { %183 = vmatpush1.bf16.msra.mxu0 %v442_v8  ;;  %v168_v16 = vsel %vm166_vm1, %v449_v15, 0  ;;  %v450_v17 = vld [vmem:[%s620_s0] ss:$8 sps:$4 sm:$0xff]   ;;  %v455_v19 = vld [vmem:[%s620_s0 + $0x10] ss:$8 sps:$4 sm:$0xff]   ;;  %s464_s22 = scalar_lea.vmem %s366_s21, 32  ;;  %p469_p1 = scmp.lt.s32.totalorder %s366_s21, %s366_s21 }
  0x1b   :  { %184 = vmatprep.subr.bf16.mxu0 %v488_v1  ;;  %v456_v20 = vld [vmem:[%s623_s3] sm:$0xff]   ;;  %v457_v22 = vld [vmem:[%s623_s3 + $0x8] sm:$0xff]   ;;  %v458_v23 = vld [vmem:[%s623_s3 + $0x10] sm:$0xff]   ;;  %p465_p0 = scmp.ne.s32.totalorder %s366_s21, %s464_s22  ;;  %p470_p2 = scmp.lt.s32.totalorder %s464_s22, %s464_s22 }
  0x1c   :  { %413 = vmatpush3.bf16.msra.mxu1 %v456_v20  ;;  %v459_v24 = vld [vmem:[%s623_s3 + $0x18] sm:$0xff]   ;;  %v460_v25 = vld [vmem:[%s623_s3 + $0x20] sm:$0xff]   ;;  %v461_v26 = vld [vmem:[%s623_s3 + $0x28] sm:$0xff]  }
  0x1d   :  { %414 = vmatprep.subr.bf16.mxu1 %v489_v21  ;;  %v462_v27 = vld [vmem:[%s623_s3 + $0x30] sm:$0xff]   ;;  %v463_v28 = vld [vmem:[%s623_s3 + $0x38] sm:$0xff]   ;;  %v373_v29 = vld [vmem:[%s622_s2] ss:$0 sm:$0xff]  ;;  %p471_p3 = por %p470_p2, %p469_p1 }
  0x1e   :  { %185 = vmatpush1.bf16.msra.mxu0 %v443_v9  ;;  %v394_v2 = vld [vmem:[%s624_s4] ss:$0 sm:$0xff] }
  0x1f   :  { %186 = vmatprep.subr.bf16.mxu0 %v488_v1  ;;  %p472_p4 = pnand %p471_p3, %p465_p0 }
  0x20   :  { %415 = vmatpush3.bf16.msra.mxu1 %v457_v22 }
  0x21   :  { %416 = vmatprep.subr.bf16.mxu1 %v489_v21 }
  0x22   :  { %187 = vmatpush1.bf16.msra.mxu0 %v444_v10 }
  0x23   :  { %188 = vmatprep.subr.bf16.mxu0 %v488_v1 }
  0x24   :  { %417 = vmatpush3.bf16.msra.mxu1 %v458_v23 }
  0x25   :  { %418 = vmatprep.subr.bf16.mxu1 %v489_v21 }
  0x26   :  { %189 = vmatpush1.bf16.msra.mxu0 %v445_v11 }
  0x27   :  { %190 = vmatprep.subr.bf16.mxu0 %v488_v1 }
  0x28   :  { %419 = vmatpush3.bf16.msra.mxu1 %v459_v24 }
  0x29   :  { %420 = vmatprep.subr.bf16.mxu1 %v489_v21 }
  0x2a   :  { %191 = vmatpush1.bf16.msra.mxu0 %v446_v12 }
  0x2b   :  { %192 = vmatprep.subr.bf16.mxu0 %v488_v1 }
  0x2c   :  { %421 = vmatpush3.bf16.msra.mxu1 %v460_v25 }
  0x2d   :  { %422 = vmatprep.subr.bf16.mxu1 %v489_v21 }
  0x2e   :  { %193 = vmatpush1.bf16.msra.mxu0 %v447_v13 }
  0x2f   :  { %194 = vmatprep.subr.bf16.mxu0 %v488_v1 }
  0x30   :  { %423 = vmatpush3.bf16.msra.mxu1 %v461_v26 }
  0x31   :  { %424 = vmatprep.subr.bf16.mxu1 %v489_v21 }
  0x32   :  { %195 = vmatpush1.bf16.msra.mxu0 %v448_v14 }
  0x33   :  { %196 = vmatprep.subr.bf16.mxu0 %v488_v1 }
  0x34   :  { %425 = vmatpush3.bf16.msra.mxu1 %v462_v27 }
  0x35   :  { %426 = vmatprep.subr.bf16.mxu1 %v489_v21 }
  0x36   :  { %197 = vmatpush1.bf16.msra.mxu0 %v168_v16 }
  0x38   :  { %427 = vmatpush3.bf16.msra.mxu1 %v463_v28 }
  0x39   :  { %203 = vmatmul.mubr.bf16.vlgmr.msra.gmra.mrb[0].mxu0 %v450_v17 }
  0x3a   :  { %393 = vmatprep.mubr.msk.bf16.mxu0 %vm159_vm0, %v453_v18 }
  0x41   :  { %211 = vmatmul.mubr.bf16.gmra.mrb[4].mxu0 %v455_v19 }
 0x10c   :  { %v204_v30 = vpop.f32.mrb[0].mxu0 }
 0x10d   :  { %v205_v31 = vadd.f32 %v373_v29, %v204_v30  ;;  %v206_v32 = vpop.f32.mrb[1].mxu0 }
 0x10e   :  { %v207_v33 = vpop.f32.mrb[2].mxu0 }
 0x10f   :  { %v208_v34 = vadd.f32 %v373_v29, %v207_v33  ;;  %v209_v35 = vpop.f32.mrb[3].mxu0  ;;  %v219_v36 = vmax.f32 %v205_v31, 0.0 }
 0x111   :  { %v220_v37 = vmax.f32 %v208_v34, 0.0 }
 0x113   :  { %v223_v38 = vadd.f32 %v220_v37, %v219_v36 }
 0x114   :  { %v212_v39 = vpop.f32.mrb[4].mxu0 }
 0x115   :  { %v224_v40 = vrot.slane %v223_v38, 4  ;;  %v213_v41 = vadd.f32 %v373_v29, %v212_v39  ;;  %v214_v42 = vpop.f32.mrb[5].mxu0 }
 0x116   :  { %v215_v43 = vpop.f32.mrb[6].mxu0 }
 0x117   :  { %v225_v44 = vadd.f32 %v224_v40, %v223_v38  ;;  %v216_v45 = vadd.f32 %v373_v29, %v215_v43  ;;  %v217_v46 = vpop.f32.mrb[7].mxu0  ;;  %v221_v48 = vmax.f32 %v213_v41, 0.0 }
 0x119   :  { %v226_v47 = vrot.slane %v225_v44, 2  ;;  %v222_v49 = vmax.f32 %v216_v45, 0.0 }
 0x11b   :  { %v227_v50 = vadd.f32 %v226_v47, %v225_v44  ;;  %v230_v51 = vadd.f32 %v222_v49, %v221_v48 }
 0x11d   :  { %v231_v52 = vrot.slane %v230_v51, 4  ;;  %v228_v53 = vrot.slane %v227_v50, 1 }
 0x11f   :  { %v232_v54 = vadd.f32 %v231_v52, %v230_v51  ;;  %v229_v56 = vadd.f32 %v228_v53, %v227_v50 }
 0x121   :  { %v233_v55 = vrot.slane %v232_v54, 2  ;;  %v237_v60 = vpack.c.bf16 %v229_v56, %v229_v56 }
 0x123   :  { %v234_v57 = vadd.f32 %v233_v55, %v232_v54  ;;  %v264_v62 = vunpack.c.l.b16 %v237_v60 }
 0x125   :  { %v235_v58 = vrot.slane %v234_v57, 1 }
 0x127   :  { %v236_v59 = vadd.f32 %v235_v58, %v234_v57 }
 0x129   :  { %v238_v61 = vpack.c.bf16 %v236_v59, %v236_v59 }
 0x12b   :  { %v265_v63 = vunpack.c.l.b16 %v238_v61 }
 0x12d   :  { %v267_v0 = vsel %vm266_vm3, %v265_v63, %v264_v62 }
 0x12e   :  { %v268_v1 = vpack.c.b16 %v267_v0, %v267_v0 }
 0x130   :  { %429 = vmatmul.mubr.bf16.vlgmr.msra.gmra.mrb[0].mxu1 %v268_v1 }
 0x203   :  { %v352_v3 = vpop.f32.mrb[0].mxu1 }
 0x204   :  { %v353_v4 = vadd.f32 %v394_v2, %v352_v3  ;;  %v430_v5 = vpop.f32.mrb[1].mxu1 }
 0x205   :  { %v355_v6 = vpop.f32.mrb[2].mxu1 }
 0x206   :  { %358 = vst [vmem:[#allocation2] sm:$0x3] %v353_v4  ;;  %v431_v7 = vpop.f32.mrb[3].mxu1 }
 0x207   :  { %475 = shalt.err (!%p472_p4)
}
 0x208   :  { %s476_s4 = scalar_lea.hbm %s625_s5, 32 }
 0x209   :  { %p477_p5 = scmp.ne.s32.totalorder %s625_s5, %s476_s4  ;;  %p480_p6 = scmp.lt.u32.totalorder %s476_s4, %s625_s5 }
 0x20b   :  { %p482_p7 = pnand %p480_p6, %p477_p5 }
 0x20d   :  { %485 = shalt.err (!%p482_p7)
}
 0x20e   :  { %368 = dma.vmem_to_hbm [thread:$0]  %s366_s21, 32, %s625_s5, [#allocation3]  }
 0x20f   :  { %486 = dma.done.wait [#allocation3], 32  }
 0x210   :  { %487 = vsyncadd [#allocation3], 4294967264 }
 0x211   :  { %372 = vsyncpa [#allocation3], 1 }

</bundles_post_ra>
